<compile_context>
chip_gen: v6e
topology: v6e:2x2x1
jax: 0.10.0
libtpu: 0.0.40
codegen_flags: <defaults>
</compile_context>

<pallas_src>
import functools

import jax
import jax.numpy as jnp
from jax.experimental import pallas as pl
from jax.experimental.pallas import tpu as pltpu

IN_FEATURES = 86
K_PAD = 128          # first-layer contraction padded to a clean lane multiple
HIDDEN = 256


def _round_up(n, m):
    return ((n + m - 1) // m) * m


def _cdiv(a, b):
    return -(-a // b)


def mlp_kernel(x_ref,
               w1_ref, b1_ref,
               w2_ref, b2_ref,
               w3_ref, b3_ref,
               w4_ref, b4_ref,
               w5_ref, b5_ref,
               o_ref):
    """One batch tile of the fused MLP. bf16 matmul inputs, f32 everywhere else."""
    # x already arrives bf16 (streamed at half the HBM bytes) — no LHS cast.
    h = jnp.dot(x_ref[...], w1_ref[...],
                preferred_element_type=jnp.float32) + b1_ref[...]
    h = jnp.maximum(h, 0.0)

    h = jnp.dot(h.astype(jnp.bfloat16), w2_ref[...],
                preferred_element_type=jnp.float32) + b2_ref[...]
    h = jnp.maximum(h, 0.0)

    h = jnp.dot(h.astype(jnp.bfloat16), w3_ref[...],
                preferred_element_type=jnp.float32) + b3_ref[...]
    h = jnp.maximum(h, 0.0)

    h = jnp.dot(h.astype(jnp.bfloat16), w4_ref[...],
                preferred_element_type=jnp.float32) + b4_ref[...]
    h = jnp.maximum(h, 0.0)

    # Final 256 -> 1 layer on VPU/XLU: a (256, 1) RHS would use 1 of 256 MXU
    # output lanes; the multiply + cross-lane reduce rides otherwise-idle slots.
    w5_row = w5_ref[...].astype(jnp.float32)                              # (1, 256)
    logits = jnp.sum(h * w5_row, axis=-1, keepdims=True) + b5_ref[...]    # (TB, 1)

    # Exact sigmoid: exp on the EUP, divide on a tiny (TB, 1) column (free).
    o_ref[...] = (1.0 / (1.0 + jnp.exp(-logits))).astype(o_ref.dtype)


def _choose_tiling(B, tile_b):
    """Pick (tile_b, n_steps): tile_b a multiple of 16, >= 2 grid steps whenever
    B allows (v7x megacore), tile derived from ceil(B/n_steps) so batch padding
    never approaches a full extra tile."""
    target = 2048 if tile_b is None else max(16, int(tile_b))
    n_steps = max(_cdiv(B, target), 2 if B >= 32 else 1)
    tb = _round_up(_cdiv(B, n_steps), 16)
    return tb, n_steps


@functools.partial(jax.jit, static_argnames=("tile_b",))
def net_forward(x, kparams, *, tile_b=None):
    """x: (B, 86) float32; kparams from prepare_params(). Returns (B, 1) float32."""
    B, F = x.shape
    assert F == IN_FEATURES
    tb, n_steps = _choose_tiling(B, tile_b)
    Bp = tb * n_steps

    # One fused pad+cast: batch -> Bp rows, features 86 -> 128 lanes, bf16.
    # (w1's padded rows are zero, so the extra lanes don't change the result;
    #  streaming bf16 halves per-row HBM bytes vs the old f32 padded copy.)
    xp = jnp.pad(x.astype(jnp.bfloat16), ((0, Bp - B), (0, K_PAD - F)))

    def resident(shape):
        # Constant block index across the batch grid -> operand is DMA'd once
        # and stays VMEM-resident; only the x tile and output tile stream.
        return pl.BlockSpec(shape, lambda i: (0, 0))

    mac_terms = K_PAD * HIDDEN + 3 * HIDDEN * HIDDEN + HIDDEN
    weight_bytes = 2 * mac_terms + 4 * (4 * HIDDEN + 1)      # bf16 W, f32 b
    cost = pl.CostEstimate(
        flops=2 * Bp * mac_terms,
        transcendentals=Bp,                                   # one exp per row
        bytes_accessed=Bp * (2 * K_PAD + 4) + weight_bytes)   # bf16 x in, f32 out

    out_p = pl.pallas_call(
        mlp_kernel,
        out_shape=jax.ShapeDtypeStruct((Bp, 1), jnp.float32),
        grid=(n_steps,),
        in_specs=[
            pl.BlockSpec((tb, K_PAD), lambda i: (i, 0)),      # x tile streams
            resident((K_PAD, HIDDEN)),  resident((1, HIDDEN)),
            resident((HIDDEN, HIDDEN)), resident((1, HIDDEN)),
            resident((HIDDEN, HIDDEN)), resident((1, HIDDEN)),
            resident((HIDDEN, HIDDEN)), resident((1, HIDDEN)),
            resident((1, HIDDEN)),      resident((1, 1)),
        ],
        out_specs=pl.BlockSpec((tb, 1), lambda i: (i, 0)),
        compiler_params=pltpu.CompilerParams(
            dimension_semantics=("parallel",),                # megacore-shardable
            vmem_limit_bytes=48 * 1024 * 1024),               # tile_b<=2048 fits all chips
        cost_estimate=cost,
    )(xp,
      kparams["w1"], kparams["b1"],
      kparams["w2"], kparams["b2"],
      kparams["w3"], kparams["b3"],
      kparams["w4"], kparams["b4"],
      kparams["w5"], kparams["b5"])

    return out_p[:B]


def init_params(key):
    """f32 reference params, PyTorch-Linear-style init, stored as (in, out)."""
    dims = [(IN_FEATURES, HIDDEN), (HIDDEN, HIDDEN), (HIDDEN, HIDDEN),
            (HIDDEN, HIDDEN), (HIDDEN, 1)]
    params = {}
    for i, (fan_in, fan_out) in enumerate(dims, start=1):
        key, kw, kb = jax.random.split(key, 3)
        bound = 1.0 / jnp.sqrt(jnp.float32(fan_in))
        params[f"w{i}"] = jax.random.uniform(
            kw, (fan_in, fan_out), jnp.float32, -bound, bound)
        params[f"b{i}"] = jax.random.uniform(
            kb, (1, fan_out), jnp.float32, -bound, bound)
    return params


def prepare_params(params):
    """Kernel layout: zero-pad w1's contraction dim 86 -> 128, cast weights to
    bf16 (biases stay f32), store w5 as a (1, 256) row for the VPU epilogue."""
    kp = {}
    kp["w1"] = jnp.pad(
        params["w1"], ((0, K_PAD - IN_FEATURES), (0, 0))).astype(jnp.bfloat16)
    kp["b1"] = params["b1"]
    for i in (2, 3, 4):
        kp[f"w{i}"] = params[f"w{i}"].astype(jnp.bfloat16)
        kp[f"b{i}"] = params[f"b{i}"]
    kp["w5"] = params["w5"].T.astype(jnp.bfloat16)          # (1, 256)
    kp["b5"] = params["b5"]                                  # (1, 1)
    return kp


def ref_forward(x, params):
    """Plain-JAX reference mirroring the kernel's bf16 matmul-input numerics."""
    xp = jnp.pad(x.astype(jnp.bfloat16), ((0, 0), (0, K_PAD - IN_FEATURES)))
    w1p = jnp.pad(params["w1"],
                  ((0, K_PAD - IN_FEATURES), (0, 0))).astype(jnp.bfloat16)
    h = jnp.dot(xp, w1p, preferred_element_type=jnp.float32) + params["b1"]
    h = jnp.maximum(h, 0.0)
    for i in (2, 3, 4):
        h = jnp.dot(h.astype(jnp.bfloat16), params[f"w{i}"].astype(jnp.bfloat16),
                    preferred_element_type=jnp.float32) + params[f"b{i}"]
        h = jnp.maximum(h, 0.0)
    w5 = params["w5"].astype(jnp.bfloat16).astype(jnp.float32)
    logits = h @ w5 + params["b5"]
    return jax.nn.sigmoid(logits)


if __name__ == "__main__":
    key = jax.random.PRNGKey(0)
    key, kx = jax.random.split(key)
    B = 128
    x = jax.random.normal(kx, (B, IN_FEATURES), jnp.float32)

    params = init_params(key)
    kparams = prepare_params(params)

    # Small demo tile so the grid has 4 steps and exercises the pipelined /
    # megacore-shardable path; production (large B) should use the default
    # tile selection (~2048-row tiles, >= 2 steps).
    out = net_forward(x, kparams, tile_b=32)
    out = jax.block_until_ready(out)

    # sanity: correct shape and sigmoid range
    assert out.shape == (B, 1)
    assert bool(jnp.all((out >= 0.0) & (out <= 1.0)))

    # numerical check against a bf16-matmul JAX reference
    ref = ref_forward(x, params)
    max_err = float(jnp.max(jnp.abs(out - ref)))
    assert max_err < 1e-2, f"max abs err {max_err}"

    print("KERNEL_OK")
</pallas_src>

<mosaic_0001>
module attributes {stable_mosaic.version = 11 : i64} {
  func.func @mlp_kernel(%arg0: i32, %arg1: memref<32x128xbf16, #tpu.memory_space<vmem>>, %arg2: memref<128x256xbf16, #tpu.memory_space<vmem>>, %arg3: memref<1x256xf32, #tpu.memory_space<vmem>>, %arg4: memref<256x256xbf16, #tpu.memory_space<vmem>>, %arg5: memref<1x256xf32, #tpu.memory_space<vmem>>, %arg6: memref<256x256xbf16, #tpu.memory_space<vmem>>, %arg7: memref<1x256xf32, #tpu.memory_space<vmem>>, %arg8: memref<256x256xbf16, #tpu.memory_space<vmem>>, %arg9: memref<1x256xf32, #tpu.memory_space<vmem>>, %arg10: memref<1x256xbf16, #tpu.memory_space<vmem>>, %arg11: memref<1x1xf32, #tpu.memory_space<vmem>>, %arg12: memref<32x1xf32, #tpu.memory_space<vmem>>) attributes {dimension_semantics = [#tpu.dimension_semantics<parallel>], iteration_bounds = array<i64: 4>, scalar_prefetch = 0 : i64, scratch_operands = 0 : i64, tpu.core_type = #tpu.core_type<tc>, window_params = [{transform_indices = @transform_0, window_bounds = array<i64: 32, 128>}, {pipeline_mode = #tpu.pipeline_mode<synchronous>, transform_indices = @transform_1, window_bounds = array<i64: 128, 256>}, {pipeline_mode = #tpu.pipeline_mode<synchronous>, transform_indices = @transform_2, window_bounds = array<i64: 1, 256>}, {pipeline_mode = #tpu.pipeline_mode<synchronous>, transform_indices = @transform_3, window_bounds = array<i64: 256, 256>}, {pipeline_mode = #tpu.pipeline_mode<synchronous>, transform_indices = @transform_4, window_bounds = array<i64: 1, 256>}, {pipeline_mode = #tpu.pipeline_mode<synchronous>, transform_indices = @transform_5, window_bounds = array<i64: 256, 256>}, {pipeline_mode = #tpu.pipeline_mode<synchronous>, transform_indices = @transform_6, window_bounds = array<i64: 1, 256>}, {pipeline_mode = #tpu.pipeline_mode<synchronous>, transform_indices = @transform_7, window_bounds = array<i64: 256, 256>}, {pipeline_mode = #tpu.pipeline_mode<synchronous>, transform_indices = @transform_8, window_bounds = array<i64: 1, 256>}, {pipeline_mode = #tpu.pipeline_mode<synchronous>, transform_indices = @transform_9, window_bounds = array<i64: 1, 256>}, {pipeline_mode = #tpu.pipeline_mode<synchronous>, transform_indices = @transform_10, window_bounds = array<i64: 1, 1>}, {transform_indices = @transform_11, window_bounds = array<i64: 32, 1>}]} {
    %c0 = arith.constant 0 : index
    %c0_0 = arith.constant 0 : index
    %0 = vector.load %arg1[%c0, %c0_0] : memref<32x128xbf16, #tpu.memory_space<vmem>>, vector<32x128xbf16>
    %c0_1 = arith.constant 0 : index
    %c0_2 = arith.constant 0 : index
    %1 = vector.load %arg2[%c0_1, %c0_2] : memref<128x256xbf16, #tpu.memory_space<vmem>>, vector<128x256xbf16>
    %cst = arith.constant dense<0.000000e+00> : vector<32x256xf32>
    %2 = tpu.matmul %0, %1, %cst {dimension_numbers = #tpu.dot_dimension_numbers<[1], [0], [0], [1], [0, 0, 1, 1], [], []>} : vector<32x128xbf16>, vector<128x256xbf16>, vector<32x256xf32> -> vector<32x256xf32>
    %c0_3 = arith.constant 0 : index
    %c0_4 = arith.constant 0 : index
    %3 = vector.load %arg3[%c0_3, %c0_4] : memref<1x256xf32, #tpu.memory_space<vmem>>, vector<1x256xf32>
    %4 = vector.broadcast %3 : vector<1x256xf32> to vector<32x256xf32>
    %5 = arith.addf %2, %4 : vector<32x256xf32>
    %cst_5 = arith.constant 0.000000e+00 : f32
    %6 = vector.broadcast %cst_5 : f32 to vector<32x256xf32>
    %7 = arith.maximumf %5, %6 : vector<32x256xf32>
    %8 = arith.truncf %7 : vector<32x256xf32> to vector<32x256xbf16>
    %c0_6 = arith.constant 0 : index
    %c0_7 = arith.constant 0 : index
    %9 = vector.load %arg4[%c0_6, %c0_7] : memref<256x256xbf16, #tpu.memory_space<vmem>>, vector<256x256xbf16>
    %cst_8 = arith.constant dense<0.000000e+00> : vector<32x256xf32>
    %10 = tpu.matmul %8, %9, %cst_8 {dimension_numbers = #tpu.dot_dimension_numbers<[1], [0], [0], [1], [0, 0, 1, 1], [], []>} : vector<32x256xbf16>, vector<256x256xbf16>, vector<32x256xf32> -> vector<32x256xf32>
    %c0_9 = arith.constant 0 : index
    %c0_10 = arith.constant 0 : index
    %11 = vector.load %arg5[%c0_9, %c0_10] : memref<1x256xf32, #tpu.memory_space<vmem>>, vector<1x256xf32>
    %12 = vector.broadcast %11 : vector<1x256xf32> to vector<32x256xf32>
    %13 = arith.addf %10, %12 : vector<32x256xf32>
    %cst_11 = arith.constant 0.000000e+00 : f32
    %14 = vector.broadcast %cst_11 : f32 to vector<32x256xf32>
    %15 = arith.maximumf %13, %14 : vector<32x256xf32>
    %16 = arith.truncf %15 : vector<32x256xf32> to vector<32x256xbf16>
    %c0_12 = arith.constant 0 : index
    %c0_13 = arith.constant 0 : index
    %17 = vector.load %arg6[%c0_12, %c0_13] : memref<256x256xbf16, #tpu.memory_space<vmem>>, vector<256x256xbf16>
    %cst_14 = arith.constant dense<0.000000e+00> : vector<32x256xf32>
    %18 = tpu.matmul %16, %17, %cst_14 {dimension_numbers = #tpu.dot_dimension_numbers<[1], [0], [0], [1], [0, 0, 1, 1], [], []>} : vector<32x256xbf16>, vector<256x256xbf16>, vector<32x256xf32> -> vector<32x256xf32>
    %c0_15 = arith.constant 0 : index
    %c0_16 = arith.constant 0 : index
    %19 = vector.load %arg7[%c0_15, %c0_16] : memref<1x256xf32, #tpu.memory_space<vmem>>, vector<1x256xf32>
    %20 = vector.broadcast %19 : vector<1x256xf32> to vector<32x256xf32>
    %21 = arith.addf %18, %20 : vector<32x256xf32>
    %cst_17 = arith.constant 0.000000e+00 : f32
    %22 = vector.broadcast %cst_17 : f32 to vector<32x256xf32>
    %23 = arith.maximumf %21, %22 : vector<32x256xf32>
    %24 = arith.truncf %23 : vector<32x256xf32> to vector<32x256xbf16>
    %c0_18 = arith.constant 0 : index
    %c0_19 = arith.constant 0 : index
    %25 = vector.load %arg8[%c0_18, %c0_19] : memref<256x256xbf16, #tpu.memory_space<vmem>>, vector<256x256xbf16>
    %cst_20 = arith.constant dense<0.000000e+00> : vector<32x256xf32>
    %26 = tpu.matmul %24, %25, %cst_20 {dimension_numbers = #tpu.dot_dimension_numbers<[1], [0], [0], [1], [0, 0, 1, 1], [], []>} : vector<32x256xbf16>, vector<256x256xbf16>, vector<32x256xf32> -> vector<32x256xf32>
    %c0_21 = arith.constant 0 : index
    %c0_22 = arith.constant 0 : index
    %27 = vector.load %arg9[%c0_21, %c0_22] : memref<1x256xf32, #tpu.memory_space<vmem>>, vector<1x256xf32>
    %28 = vector.broadcast %27 : vector<1x256xf32> to vector<32x256xf32>
    %29 = arith.addf %26, %28 : vector<32x256xf32>
    %cst_23 = arith.constant 0.000000e+00 : f32
    %30 = vector.broadcast %cst_23 : f32 to vector<32x256xf32>
    %31 = arith.maximumf %29, %30 : vector<32x256xf32>
    %c0_24 = arith.constant 0 : index
    %c0_25 = arith.constant 0 : index
    %32 = vector.load %arg10[%c0_24, %c0_25] : memref<1x256xbf16, #tpu.memory_space<vmem>>, vector<1x256xbf16>
    %33 = arith.extf %32 : vector<1x256xbf16> to vector<1x256xf32>
    %34 = vector.broadcast %33 : vector<1x256xf32> to vector<32x256xf32>
    %35 = arith.mulf %31, %34 : vector<32x256xf32>
    %cst_26 = arith.constant dense<0.000000e+00> : vector<32xf32>
    %36 = vector.multi_reduction <add>, %35, %cst_26 [1] : vector<32x256xf32> to vector<32xf32>
    %37 = vector.shape_cast %36 : vector<32xf32> to vector<32x1xf32>
    %c0_27 = arith.constant 0 : index
    %c0_28 = arith.constant 0 : index
    %38 = vector.load %arg11[%c0_27, %c0_28] : memref<1x1xf32, #tpu.memory_space<vmem>>, vector<1x1xf32>
    %39 = vector.broadcast %38 : vector<1x1xf32> to vector<32x1xf32>
    %40 = arith.addf %37, %39 : vector<32x1xf32>
    %cst_29 = arith.constant 0.000000e+00 : f32
    %41 = vector.broadcast %cst_29 : f32 to vector<32x1xf32>
    %42 = arith.subf %41, %40 : vector<32x1xf32>
    %43 = math.exp %42 : vector<32x1xf32>
    %cst_30 = arith.constant 1.000000e+00 : f32
    %44 = vector.broadcast %cst_30 : f32 to vector<32x1xf32>
    %45 = arith.addf %44, %43 : vector<32x1xf32>
    %cst_31 = arith.constant 1.000000e+00 : f32
    %46 = vector.broadcast %cst_31 : f32 to vector<32x1xf32>
    %47 = arith.divf %46, %45 : vector<32x1xf32>
    %c0_32 = arith.constant 0 : index
    %c0_33 = arith.constant 0 : index
    %48 = vector.load %arg12[%c0_32, %c0_33] : memref<32x1xf32, #tpu.memory_space<vmem>>, vector<32x1xf32>
    tpu.vector_store %arg12[%c0_32, %c0_33], %47 {strides = array<i32>} : memref<32x1xf32, #tpu.memory_space<vmem>>, vector<32x1xf32>,
    return
  }
  func.func @transform_0(%arg0: i32) -> (i32, i32) {
    %c0_i32 = arith.constant 0 : i32
    %c0_i32_0 = arith.constant 0 : i32
    return %arg0, %c0_i32 : i32, i32
  }
  func.func @transform_1(%arg0: i32) -> (i32, i32) {
    %c0_i32 = arith.constant 0 : i32
    %c0_i32_0 = arith.constant 0 : i32
    %c0_i32_1 = arith.constant 0 : i32
    return %c0_i32, %c0_i32_0 : i32, i32
  }
  func.func @transform_2(%arg0: i32) -> (i32, i32) {
    %c0_i32 = arith.constant 0 : i32
    %c0_i32_0 = arith.constant 0 : i32
    %c0_i32_1 = arith.constant 0 : i32
    return %c0_i32, %c0_i32_0 : i32, i32
  }
  func.func @transform_3(%arg0: i32) -> (i32, i32) {
    %c0_i32 = arith.constant 0 : i32
    %c0_i32_0 = arith.constant 0 : i32
    %c0_i32_1 = arith.constant 0 : i32
    return %c0_i32, %c0_i32_0 : i32, i32
  }
  func.func @transform_4(%arg0: i32) -> (i32, i32) {
    %c0_i32 = arith.constant 0 : i32
    %c0_i32_0 = arith.constant 0 : i32
    %c0_i32_1 = arith.constant 0 : i32
    return %c0_i32, %c0_i32_0 : i32, i32
  }
  func.func @transform_5(%arg0: i32) -> (i32, i32) {
    %c0_i32 = arith.constant 0 : i32
    %c0_i32_0 = arith.constant 0 : i32
    %c0_i32_1 = arith.constant 0 : i32
    return %c0_i32, %c0_i32_0 : i32, i32
  }
  func.func @transform_6(%arg0: i32) -> (i32, i32) {
    %c0_i32 = arith.constant 0 : i32
    %c0_i32_0 = arith.constant 0 : i32
    %c0_i32_1 = arith.constant 0 : i32
    return %c0_i32, %c0_i32_0 : i32, i32
  }
  func.func @transform_7(%arg0: i32) -> (i32, i32) {
    %c0_i32 = arith.constant 0 : i32
    %c0_i32_0 = arith.constant 0 : i32
    %c0_i32_1 = arith.constant 0 : i32
    return %c0_i32, %c0_i32_0 : i32, i32
  }
  func.func @transform_8(%arg0: i32) -> (i32, i32) {
    %c0_i32 = arith.constant 0 : i32
    %c0_i32_0 = arith.constant 0 : i32
    %c0_i32_1 = arith.constant 0 : i32
    return %c0_i32, %c0_i32_0 : i32, i32
  }
  func.func @transform_9(%arg0: i32) -> (i32, i32) {
    %c0_i32 = arith.constant 0 : i32
    %c0_i32_0 = arith.constant 0 : i32
    %c0_i32_1 = arith.constant 0 : i32
    return %c0_i32, %c0_i32_0 : i32, i32
  }
  func.func @transform_10(%arg0: i32) -> (i32, i32) {
    %c0_i32 = arith.constant 0 : i32
    %c0_i32_0 = arith.constant 0 : i32
    %c0_i32_1 = arith.constant 0 : i32
    return %c0_i32, %c0_i32_0 : i32, i32
  }
  func.func @transform_11(%arg0: i32) -> (i32, i32) {
    %c0_i32 = arith.constant 0 : i32
    %c0_i32_0 = arith.constant 0 : i32
    return %arg0, %c0_i32 : i32, i32
  }
}

</mosaic_0001>

<bundles_post_ra>
// kernel: net_forward.1
= control target key start
LH: loop header
LB: loop body
LE: loop exit
PB: predicated region body
PF: predicated region fallthrough
CT: control target
= control target key end

     0   :  { %s2341_s0 = inlined_call_operand.vmem [shape: bf16[128,128], index: 0, kind: input, shape index: {}]   ;;  %s2342_s1 = inlined_call_operand.hbm [shape: bf16[128,256], index: 1, kind: input, shape index: {}]   ;;  %s2343_s2 = inlined_call_operand.vmem [shape: f32[1,256], index: 2, kind: input, shape index: {}]   ;;  %s2344_s3 = inlined_call_operand.vmem [shape: bf16[256,256], index: 3, kind: input, shape index: {}]   ;;  %s2345_s4 = inlined_call_operand.vmem [shape: f32[1,256], index: 4, kind: input, shape index: {}]   ;;  %s2346_s5 = inlined_call_operand.hbm [shape: bf16[256,256], index: 5, kind: input, shape index: {}]   ;;  %s2347_s6 = inlined_call_operand.vmem [shape: f32[1,256], index: 6, kind: input, shape index: {}]   ;;  %s2348_s7 = inlined_call_operand.hbm [shape: bf16[256,256], index: 7, kind: input, shape index: {}]   ;;  %s2349_s8 = inlined_call_operand.vmem [shape: f32[1,256], index: 8, kind: input, shape index: {}]   ;;  %s2350_s9 = inlined_call_operand.vmem [shape: bf16[1,256], index: 9, kind: input, shape index: {}]   ;;  %s2351_s10 = inlined_call_operand.<no memory space> [shape: f32[1,1], index: 10, kind: input, shape index: {}]   ;;  %s2352_s11 = inlined_call_operand.vmem [shape: f32[128,1], index: 11, kind: output, shape index: {}]  }
   0x1   :  { %v16_v0 = vstv %s2351_s10 }
   0x2   :  { %17 = vst [vmem:[#allocation2] sm:$0x1] %v16_v0 }
   0x3   :  { %18 = vsyncpa [#allocation4], 0 }
   0x4   :  { %19 = vsyncpa [#allocation6], 0  ;;  %s2120_s19 = smov 0  }
   0x5 LB: > { %s1597_s20 = sadd.s32 4294967295, %s2049_s19   ;;  %p1599_p0 = scmp.ge.s32.totalorder %s2049_s19, 1  ;;  %s2049_s19 = sphi %s2120_s19, %s25_s19  }
   0x6   : > { %p292_p1 = scmp.lt.s32.totalorder %s2049_s19, 5  ;;  %p2130_p2 = scmp.eq.s32.totalorder %s1597_s20, 0 }
   0x7   : > { %s2051_s22 = smov [#allocation5]   ;;  %s2052_s24 = smov [#allocation3]  }
   0x8   : > { %p2134_p3 = pnand %p1599_p0, %p292_p1  ;;  %s326_s23 = sshll.u32 %s2051_s22, 4  ;;  %s327_s23 = int_to_ptr.vmem [resolvable:$true] %s326_s23 }
   0x9   : > { %s304_s25 = sshll.u32 %s2052_s24, 4  ;;  %s2053_s27 = smov [#allocation7]   ;;  %s305_s25 = int_to_ptr.vmem [resolvable:$true] %s304_s25 }
   0xa   : > { %p1741_p4 = pneg %p2134_p3  ;;  %s342_s28 = sshll.u32 %s2053_s27, 4  ;;  %s2146_s28 = int_to_ptr.vmem [resolvable:$true] %s342_s28 }
   0xb   : > { %s1968_s29 = scalar_lea.vmem %s327_s23, 4096  ;;  %p1976_p10 = scmp.lt.s32.totalorder %s327_s23, %s327_s23 }
   0xc   : > { %p2142_p5 = pnand %p2130_p2, %p1741_p4  ;;  %p1969_p7 = scmp.ne.s32.totalorder %s327_s23, %s1968_s29 }
   0xd   : > { %p1977_p11 = scmp.lt.s32.totalorder %s1968_s29, %s1968_s29 }
   0xe   : > { %p1959_p6 = pneg %p2142_p5 }
   0xf   : > { %p1978_p12 = por %p1977_p11, %p1976_p10 }
  0x10   : > { %p1971_p8 = pnand %p1969_p7, %p1959_p6 }
  0x12   : > { %p1972_p9 = pneg %p1971_p8 }
  0x14   : > { %p1979_p13 = pnand %p1978_p12, %p1972_p9 }
  0x16   : > { %1982 = shalt.err (!%p1979_p13)
}
  0x17   : > { %s2054_s30 = smov 128   ;;  %s2055_s12 = smov 8  }
  0x18   : > { %1747 = dma.hbm_to_vmem [thread:$0]  (!%p2142_p5), %s2346_s5, 4096, %s327_s23, [#allocation6], %s2054_s30, %s2054_s30, %s2055_s12  }
  0x19   : > { %s1994_s15 = scalar_lea.vmem %s305_s25, 2048  ;;  %p2002_p7 = scmp.lt.s32.totalorder %s305_s25, %s305_s25 }
  0x1a   : > { %p1995_p0 = scmp.ne.s32.totalorder %s305_s25, %s1994_s15  ;;  %p2003_p8 = scmp.lt.s32.totalorder %s1994_s15, %s1994_s15 }
  0x1c   : > { %p1997_p1 = pnand %p1995_p0, %p1959_p6  ;;  %p2004_p10 = por %p2003_p8, %p2002_p7 }
  0x1e   : > { %p1998_p4 = pneg %p1997_p1 }
  0x20   : > { %p2005_p9 = pnand %p2004_p10, %p1998_p4 }
  0x22   : > { %2008 = shalt.err (!%p2005_p9)
}
  0x23   : > { %1744 = dma.hbm_to_vmem [thread:$0]  (!%p2142_p5), %s2342_s1, 2048, %s305_s25, [#allocation4], %s2054_s30, %s2054_s30, %s2055_s12  }
  0x24   : > { %s2020_s18 = scalar_lea.vmem %s2146_s28, 4096  ;;  %p2028_p0 = scmp.lt.s32.totalorder %s2146_s28, %s2146_s28 }
  0x25   : > { %p2021_p11 = scmp.ne.s32.totalorder %s2146_s28, %s2020_s18  ;;  %p2029_p1 = scmp.lt.s32.totalorder %s2020_s18, %s2020_s18 }
  0x27   : > { %p2023_p12 = pnand %p2021_p11, %p1959_p6  ;;  %p2030_p4 = por %p2029_p1, %p2028_p0 }
  0x29   : > { %p2024_p13 = pneg %p2023_p12 }
  0x2b   : > { %p2031_p7 = pnand %p2030_p4, %p2024_p13 }
  0x2d   : > { %2034 = shalt.err (!%p2031_p7)
}
  0x2e   : > { %1750 = dma.hbm_to_vmem [thread:$0]  (!%p2142_p5), %s2348_s7, 4096, %s2146_s28, [#allocation6], %s2054_s30, %s2054_s30, %s2055_s12  }
  0x2f   : > { %376 = sbr.rel (%p2134_p3) target bundleno = 1096 (0x448), region = 64 }
  0x34   : > { %2040 = dma.done.wait (%p2130_p2), [#allocation4], 2048  }
  0x35   : > { %2042 = vsyncadd (%p2130_p2), [#allocation4], 4294965248 }
  0x36   : > { %2044 = dma.done.wait (%p2130_p2), [#allocation6], 8192  }
  0x37   : > { %2046 = vsyncadd (%p2130_p2), [#allocation6], 4294959104  ;;  %v2056_v1 = vmov 0   ;;  %s1608_s24 = sshll.u32 %s1597_s20, 2  ;;  %v1771_v2 = vld [vmem:[#allocation3 + $0x74] ss:$8 sps:$4 sm:$0xff]  }
  0x38   : > { %593 = vmatprep.mubr.bf16.mxu0 %v2056_v1  ;;  %p425_p5 = scmp.lt.s32.totalorder %s1608_s24, 15  ;;  %v1773_v3 = vld [vmem:[#allocation3 + $0x70] ss:$8 sps:$4 sm:$0xff]   ;;  %561 = vmatprep.subr.bf16.mxu0 %v1771_v2  ;;  %v1774_v4 = vld [vmem:[#allocation3 + $0x64] ss:$8 sps:$4 sm:$0xff]   ;;  %vm1505_vm0 = vcmask 7168  }
  0x39   : > { %562 = vmatpush1.bf16.msra.mxu0 %v1773_v3  ;;  %v1776_v5 = vld [vmem:[#allocation3 + $0x60] ss:$8 sps:$4 sm:$0xff]   ;;  %v1777_v6 = vld [vmem:[#allocation3 + $0x54] ss:$8 sps:$4 sm:$0xff]   ;;  %v1779_v7 = vld [vmem:[#allocation3 + $0x50] ss:$8 sps:$4 sm:$0xff]  }
  0x3a   : > { %s2357_s24 = smov (!%p425_p5, %s1608_s24), 15  ;;  %563 = vmatprep.subr.bf16.mxu0 %v1774_v4  ;;  %v1780_v8 = vld [vmem:[#allocation3 + $0x44] ss:$8 sps:$4 sm:$0xff]   ;;  %v1782_v9 = vld [vmem:[#allocation3 + $0x40] ss:$8 sps:$4 sm:$0xff]  }
  0x3b   : > { %s1609_s10 = sshll.u32 %s2357_s24, 2  ;;  %v1783_v10 = vld [vmem:[#allocation3 + $0x34] ss:$8 sps:$4 sm:$0xff]   ;;  %v1800_v13 = vld [vmem:[%s2344_s3 + $0x64] ss:$8 sps:$4 sm:$0xff]  }
  0x3c   : > { %s2198_s20 = scalar_lea.vmem %s2341_s0, %s1609_s10  ;;  %v1797_v11 = vld [vmem:[%s2344_s3 + $0x74] ss:$8 sps:$4 sm:$0xff]   ;;  %v1799_v12 = vld [vmem:[%s2344_s3 + $0x70] ss:$8 sps:$4 sm:$0xff]   ;;  %v1802_v16 = vld [vmem:[%s2344_s3 + $0x60] ss:$8 sps:$4 sm:$0xff]  }
  0x3d   : > { %564 = vmatpush1.bf16.msra.mxu0 %v1776_v5  ;;  %v1785_v14 = vld [vmem:[#allocation3 + $0x30] ss:$8 sps:$4 sm:$0xff]   ;;  %830 = vmatprep.subr.bf16.mxu1 %v1797_v11  ;;  %v1786_v15 = vld [vmem:[#allocation3 + $0x24] ss:$8 sps:$4 sm:$0xff]   ;;  %v1788_v18 = vld [vmem:[#allocation3 + $0x20] ss:$8 sps:$4 sm:$0xff]  }
  0x3e   : > { %565 = vmatprep.subr.bf16.mxu0 %v1777_v6  ;;  %831 = vmatpush1.bf16.msra.mxu1 %v1799_v12  ;;  %v1803_v17 = vld [vmem:[%s2344_s3 + $0x54] ss:$8 sps:$4 sm:$0xff]   ;;  %v1805_v20 = vld [vmem:[%s2344_s3 + $0x50] ss:$8 sps:$4 sm:$0xff]   ;;  %v1806_v21 = vld [vmem:[%s2344_s3 + $0x44] ss:$8 sps:$4 sm:$0xff]  }
  0x3f   : > { %832 = vmatprep.subr.bf16.mxu1 %v1800_v13  ;;  %v1789_v19 = vld [vmem:[#allocation3 + $0x14] ss:$8 sps:$4 sm:$0xff]   ;;  %v1791_v22 = vld [vmem:[#allocation3 + $0x10] ss:$8 sps:$4 sm:$0xff]   ;;  %v1792_v23 = vld [vmem:[#allocation3 + $0x4] ss:$8 sps:$4 sm:$0xff]  }
  0x40   : > { %v1808_v24 = vld [vmem:[%s2344_s3 + $0x40] ss:$8 sps:$4 sm:$0xff]   ;;  %v1809_v25 = vld [vmem:[%s2344_s3 + $0x34] ss:$8 sps:$4 sm:$0xff]   ;;  %v1811_v27 = vld [vmem:[%s2344_s3 + $0x30] ss:$8 sps:$4 sm:$0xff]  }
  0x41   : > { %566 = vmatpush1.bf16.msra.mxu0 %v1779_v7  ;;  %v1794_v26 = vld [vmem:[#allocation3] ss:$8 sps:$4 sm:$0xff]   ;;  %v1815_v31 = vld [vmem:[%s2344_s3 + $0x14] ss:$8 sps:$4 sm:$0xff]   ;;  %v1817_v32 = vld [vmem:[%s2344_s3 + $0x10] ss:$8 sps:$4 sm:$0xff]  }
  0x42   : > { %567 = vmatprep.subr.bf16.mxu0 %v1780_v8  ;;  %833 = vmatpush1.bf16.msra.mxu1 %v1802_v16  ;;  %v1795_v28 = vld [vmem:[%s2198_s20] sm:$0xff]   ;;  %v1796_v34 = vld [vmem:[%s2198_s20 + $0x8] sm:$0xff]   ;;  %v1821_v36 = vld [vmem:[%s2344_s3 + $0xf4] ss:$8 sps:$4 sm:$0xff]   ;;  %s1611_s20 = sshll.u32 %s2357_s24, 3 }
  0x43   : > { %834 = vmatprep.subr.bf16.mxu1 %v1803_v17  ;;  %v1812_v29 = vld [vmem:[%s2344_s3 + $0x24] ss:$8 sps:$4 sm:$0xff]   ;;  %v1814_v30 = vld [vmem:[%s2344_s3 + $0x20] ss:$8 sps:$4 sm:$0xff]   ;;  %v1823_v37 = vld [vmem:[%s2344_s3 + $0xf0] ss:$8 sps:$4 sm:$0xff]   ;;  %s434_s13 = scalar_lea.vmem %s2352_s11, %s1611_s20 }
  0x44   : > { %v1818_v33 = vld [vmem:[%s2344_s3 + $0x4] ss:$8 sps:$4 sm:$0xff]   ;;  %v1820_v35 = vld [vmem:[%s2344_s3] ss:$8 sps:$4 sm:$0xff]   ;;  %v1827_v40 = vld [vmem:[%s2344_s3 + $0xd4] ss:$8 sps:$4 sm:$0xff]  }
  0x45   : > { %568 = vmatpush1.bf16.msra.mxu0 %v1782_v9  ;;  %v1824_v38 = vld [vmem:[%s2344_s3 + $0xe4] ss:$8 sps:$4 sm:$0xff]   ;;  %v1826_v39 = vld [vmem:[%s2344_s3 + $0xe0] ss:$8 sps:$4 sm:$0xff]   ;;  %v1829_v41 = vld [vmem:[%s2344_s3 + $0xd0] ss:$8 sps:$4 sm:$0xff]  }
  0x46   : > { %569 = vmatprep.subr.bf16.mxu0 %v1783_v10  ;;  %835 = vmatpush1.bf16.msra.mxu1 %v1805_v20  ;;  %v1830_v42 = vld [vmem:[%s2344_s3 + $0xc4] ss:$8 sps:$4 sm:$0xff]   ;;  %v1832_v43 = vld [vmem:[%s2344_s3 + $0xc0] ss:$8 sps:$4 sm:$0xff]   ;;  %v1833_v44 = vld [vmem:[%s2344_s3 + $0xb4] ss:$8 sps:$4 sm:$0xff]  }
  0x47   : > { %836 = vmatprep.subr.bf16.mxu1 %v1806_v21  ;;  %v1835_v45 = vld [vmem:[%s2344_s3 + $0xb0] ss:$8 sps:$4 sm:$0xff]   ;;  %v1836_v46 = vld [vmem:[%s2344_s3 + $0xa4] ss:$8 sps:$4 sm:$0xff]   ;;  %v1838_v47 = vld [vmem:[%s2344_s3 + $0xa0] ss:$8 sps:$4 sm:$0xff]  }
  0x48   : > { %v1839_v48 = vld [vmem:[%s2344_s3 + $0x94] ss:$8 sps:$4 sm:$0xff]   ;;  %v1841_v49 = vld [vmem:[%s2344_s3 + $0x90] ss:$8 sps:$4 sm:$0xff]   ;;  %v1842_v50 = vld [vmem:[%s2344_s3 + $0x84] ss:$8 sps:$4 sm:$0xff]  }
  0x49   : > { %570 = vmatpush1.bf16.msra.mxu0 %v1785_v14  ;;  %v1844_v51 = vld [vmem:[%s2344_s3 + $0x80] ss:$8 sps:$4 sm:$0xff]   ;;  %v1845_v52 = vld [vmem:[#allocation5 + $0x70] ss:$8 sps:$4 sm:$0xff]   ;;  %v459_v14 = vlaneseq }
  0x4a   : > { %571 = vmatprep.subr.bf16.mxu0 %v1786_v15  ;;  %837 = vmatpush1.bf16.msra.mxu1 %v1808_v24  ;;  %v1847_v53 = vld [vmem:[#allocation5 + $0x74] ss:$8 sps:$4 sm:$0xff]   ;;  %v1850_v54 = vld [vmem:[#allocation5 + $0x64] ss:$8 sps:$4 sm:$0xff]   ;;  %v1848_v55 = vld [vmem:[#allocation5 + $0x60] ss:$8 sps:$4 sm:$0xff]  }
  0x4b   : > { %838 = vmatprep.subr.bf16.mxu1 %v1809_v25  ;;  %v1853_v56 = vld [vmem:[#allocation5 + $0x54] ss:$8 sps:$4 sm:$0xff]   ;;  %v1851_v57 = vld [vmem:[#allocation5 + $0x50] ss:$8 sps:$4 sm:$0xff]   ;;  %v1856_v58 = vld [vmem:[#allocation5 + $0x44] ss:$8 sps:$4 sm:$0xff]  }
  0x4c   : > { %v1854_v59 = vld [vmem:[#allocation5 + $0x40] ss:$8 sps:$4 sm:$0xff]   ;;  %v1859_v60 = vld [vmem:[#allocation5 + $0x34] ss:$8 sps:$4 sm:$0xff]   ;;  %v1857_v61 = vld [vmem:[#allocation5 + $0x30] ss:$8 sps:$4 sm:$0xff]  }
  0x4d   : > { %572 = vmatpush1.bf16.msra.mxu0 %v1788_v18  ;;  %v1862_v62 = vld [vmem:[#allocation5 + $0x24] ss:$8 sps:$4 sm:$0xff]   ;;  %v1860_v63 = vld [vmem:[#allocation5 + $0x20] ss:$8 sps:$4 sm:$0xff]   ;;  %v1865_v0 = vld [vmem:[#allocation5 + $0x14] ss:$8 sps:$4 sm:$0xff]  }
  0x4e   : > { %573 = vmatprep.subr.bf16.mxu0 %v1789_v19  ;;  %839 = vmatpush1.bf16.msra.mxu1 %v1811_v27  ;;  %v1868_v2 = vld [vmem:[#allocation5 + $0x4] ss:$8 sps:$4 sm:$0xff]   ;;  %v1866_v3 = vld [vmem:[#allocation5] ss:$8 sps:$4 sm:$0xff]   ;;  %v1871_v4 = vld [vmem:[#allocation5 + $0xf4] ss:$8 sps:$4 sm:$0xff]  }
  0x4f   : > { %840 = vmatprep.subr.bf16.mxu1 %v1812_v29  ;;  %v1869_v5 = vld [vmem:[#allocation5 + $0xf0] ss:$8 sps:$4 sm:$0xff]   ;;  %v1874_v6 = vld [vmem:[#allocation5 + $0xe4] ss:$8 sps:$4 sm:$0xff]   ;;  %v1872_v7 = vld [vmem:[#allocation5 + $0xe0] ss:$8 sps:$4 sm:$0xff]  }
  0x50   : > { %v1877_v8 = vld [vmem:[#allocation5 + $0xd4] ss:$8 sps:$4 sm:$0xff]   ;;  %v1875_v9 = vld [vmem:[#allocation5 + $0xd0] ss:$8 sps:$4 sm:$0xff]   ;;  %v1880_v10 = vld [vmem:[#allocation5 + $0xc4] ss:$8 sps:$4 sm:$0xff]  }
  0x51   : > { %574 = vmatpush1.bf16.msra.mxu0 %v1791_v22  ;;  %v1878_v11 = vld [vmem:[#allocation5 + $0xc0] ss:$8 sps:$4 sm:$0xff]   ;;  %v1883_v12 = vld [vmem:[#allocation5 + $0xb4] ss:$8 sps:$4 sm:$0xff]   ;;  %v1881_v13 = vld [vmem:[#allocation5 + $0xb0] ss:$8 sps:$4 sm:$0xff]  }
  0x52   : > { %575 = vmatprep.subr.bf16.mxu0 %v1792_v23  ;;  %841 = vmatpush1.bf16.msra.mxu1 %v1814_v30  ;;  %v2299_v15 = vshrl.u32 %v459_v14, 7  ;;  %v457_v18 = vld [vmem:[%s2343_s2] sm:$0x3] }
  0x53   : > { %842 = vmatprep.subr.bf16.mxu1 %v1815_v31  ;;  %v1926_v14 = vld [vmem:[#allocation7 + $0xc0] ss:$8 sps:$4 sm:$0xff]  }
  0x54   : > { %v2302_v16 = vsub.s32 1, %v2299_v15  ;;  %v2305_v17 = vsub.s32 0, %v2299_v15 }
  0x55   : > { %576 = vmatpush1.bf16.msra.mxu0 %v1794_v26 }
  0x56   : > { %843 = vmatpush1.bf16.msra.mxu1 %v1817_v32  ;;  %1099 = vmatprep.subr.bf16.mxu0 %v1847_v53  ;;  %v466_v20 = vrot.slane %v457_v18, %v2302_v16  ;;  %v462_v21 = vrot.slane %v457_v18, %v2305_v17  ;;  %v1892_v53 = vld [vmem:[#allocation5 + $0x84] ss:$8 sps:$4 sm:$0xff]   ;;  %v1931_v18 = vld [vmem:[#allocation7 + $0xb4] ss:$8 sps:$4 sm:$0xff]  }
  0x57   : > { %844 = vmatprep.subr.bf16.mxu1 %v1818_v33 }
  0x58   : > { %594 = vmatmul.mubr.bf16.vlgmr.msra.gmra.mxu0 %v1795_v28 }
  0x59   : > { %603 = vmatprep.mubr.bf16.mxu0 %v2056_v1  ;;  %1100 = vmatpush1.bf16.msra.mxu0 %v1845_v52  ;;  %v1863_v1 = vld [vmem:[#allocation5 + $0x10] ss:$8 sps:$4 sm:$0xff]  }
  0x5a   : > { %845 = vmatpush1.bf16.msra.mxu1 %v1820_v35  ;;  %1101 = vmatprep.subr.bf16.mxu0 %v1850_v54  ;;  %v1887_v52 = vld [vmem:[#allocation5 + $0x90] ss:$8 sps:$4 sm:$0xff]   ;;  %v1890_v54 = vld [vmem:[#allocation5 + $0x80] ss:$8 sps:$4 sm:$0xff]  }
  0x5b   : > { %846 = vmatprep.subr.bf16.mxu1 %v1821_v36 }
  0x5d   : > { %1102 = vmatpush1.bf16.msra.mxu0 %v1848_v55  ;;  %v1893_v55 = vld [vmem:[#allocation7 + $0x70] ss:$8 sps:$4 sm:$0xff]  }
  0x5e   : > { %847 = vmatpush2.bf16.msra.mxu1 %v1823_v37  ;;  %1103 = vmatprep.subr.bf16.mxu0 %v1853_v56  ;;  %v1895_v56 = vld [vmem:[#allocation7 + $0x74] ss:$8 sps:$4 sm:$0xff]  }
  0x5f   : > { %848 = vmatprep.subr.bf16.mxu1 %v1824_v38 }
  0x60   : > { %604 = vmatmul.mubr.bf16.gmra.mxu0 %v1796_v34 }
  0x61   : > { %1104 = vmatpush1.bf16.msra.mxu0 %v1851_v57  ;;  %v1898_v57 = vld [vmem:[#allocation7 + $0x64] ss:$8 sps:$4 sm:$0xff]  }
  0x62   : > { %849 = vmatpush2.bf16.msra.mxu1 %v1826_v39  ;;  %1105 = vmatprep.subr.bf16.mxu0 %v1856_v58  ;;  %v1896_v58 = vld [vmem:[#allocation7 + $0x60] ss:$8 sps:$4 sm:$0xff]  }
  0x63   : > { %850 = vmatprep.subr.bf16.mxu1 %v1827_v40 }
  0x65   : > { %1106 = vmatpush1.bf16.msra.mxu0 %v1854_v59  ;;  %v1901_v59 = vld [vmem:[#allocation7 + $0x54] ss:$8 sps:$4 sm:$0xff]  }
  0x66   : > { %851 = vmatpush2.bf16.msra.mxu1 %v1829_v41  ;;  %1107 = vmatprep.subr.bf16.mxu0 %v1859_v60  ;;  %v1899_v60 = vld [vmem:[#allocation7 + $0x50] ss:$8 sps:$4 sm:$0xff]  }
  0x67   : > { %852 = vmatprep.subr.bf16.mxu1 %v1830_v42 }
  0x69   : > { %1108 = vmatpush1.bf16.msra.mxu0 %v1857_v61  ;;  %v1904_v61 = vld [vmem:[#allocation7 + $0x44] ss:$8 sps:$4 sm:$0xff]  }
  0x6a   : > { %853 = vmatpush2.bf16.msra.mxu1 %v1832_v43  ;;  %1109 = vmatprep.subr.bf16.mxu0 %v1862_v62  ;;  %v1902_v62 = vld [vmem:[#allocation7 + $0x40] ss:$8 sps:$4 sm:$0xff]  }
  0x6b   : > { %854 = vmatprep.subr.bf16.mxu1 %v1833_v44 }
  0x6d   : > { %1110 = vmatpush1.bf16.msra.mxu0 %v1860_v63  ;;  %v1907_v63 = vld [vmem:[#allocation7 + $0x34] ss:$8 sps:$4 sm:$0xff]  }
  0x6e   : > { %855 = vmatpush2.bf16.msra.mxu1 %v1835_v45  ;;  %1111 = vmatprep.subr.bf16.mxu0 %v1865_v0  ;;  %v1905_v0 = vld [vmem:[#allocation7 + $0x30] ss:$8 sps:$4 sm:$0xff]  }
  0x6f   : > { %856 = vmatprep.subr.bf16.mxu1 %v1836_v46 }
  0x71   : > { %1112 = vmatpush1.bf16.msra.mxu0 %v1863_v1  ;;  %v1910_v1 = vld [vmem:[#allocation7 + $0x24] ss:$8 sps:$4 sm:$0xff]  }
  0x72   : > { %857 = vmatpush2.bf16.msra.mxu1 %v1838_v47  ;;  %1113 = vmatprep.subr.bf16.mxu0 %v1868_v2  ;;  %v1908_v2 = vld [vmem:[#allocation7 + $0x20] ss:$8 sps:$4 sm:$0xff]  }
  0x73   : > { %858 = vmatprep.subr.bf16.mxu1 %v1839_v48 }
  0x75   : > { %1114 = vmatpush1.bf16.msra.mxu0 %v1866_v3  ;;  %v1913_v3 = vld [vmem:[#allocation7 + $0x14] ss:$8 sps:$4 sm:$0xff]  }
  0x76   : > { %859 = vmatpush2.bf16.msra.mxu1 %v1841_v49  ;;  %1115 = vmatprep.subr.bf16.mxu0 %v1871_v4  ;;  %v1886_v49 = vld [vmem:[#allocation5 + $0xa4] ss:$8 sps:$4 sm:$0xff]   ;;  %v1911_v4 = vld [vmem:[#allocation7 + $0x10] ss:$8 sps:$4 sm:$0xff]  }
  0x77   : > { %860 = vmatprep.subr.bf16.mxu1 %v1842_v50  ;;  %v1884_v50 = vld [vmem:[#allocation5 + $0xa0] ss:$8 sps:$4 sm:$0xff]  }
  0x79   : > { %1116 = vmatpush2.bf16.msra.mxu0 %v1869_v5  ;;  %v1916_v5 = vld [vmem:[#allocation7 + $0x4] ss:$8 sps:$4 sm:$0xff]  }
  0x7a   : > { %861 = vmatpush2.bf16.msra.mxu1 %v1844_v51  ;;  %1117 = vmatprep.subr.bf16.mxu0 %v1874_v6  ;;  %v1889_v51 = vld [vmem:[#allocation5 + $0x94] ss:$8 sps:$4 sm:$0xff]   ;;  %v1914_v6 = vld [vmem:[#allocation7] ss:$8 sps:$4 sm:$0xff]  }
  0x7b   : > { %1368 = vmatprep.subr.bf16.mxu1 %v1895_v56  ;;  %v1938_v56 = vld [vmem:[#allocation7 + $0x80] ss:$8 sps:$4 sm:$0xff]  }
  0x7d   : > { %1118 = vmatpush2.bf16.msra.mxu0 %v1872_v7  ;;  %v1919_v7 = vld [vmem:[#allocation7 + $0xf4] ss:$8 sps:$4 sm:$0xff]  }
  0x7e   : > { %1119 = vmatprep.subr.bf16.mxu0 %v1877_v8  ;;  %v1917_v8 = vld [vmem:[#allocation7 + $0xf0] ss:$8 sps:$4 sm:$0xff]  }
  0x81   : > { %1120 = vmatpush2.bf16.msra.mxu0 %v1875_v9  ;;  %v1922_v9 = vld [vmem:[#allocation7 + $0xe4] ss:$8 sps:$4 sm:$0xff]  }
  0x82   : > { %1121 = vmatprep.subr.bf16.mxu0 %v1880_v10  ;;  %v1920_v10 = vld [vmem:[#allocation7 + $0xe0] ss:$8 sps:$4 sm:$0xff]  }
  0x85   : > { %1122 = vmatpush2.bf16.msra.mxu0 %v1878_v11  ;;  %v1925_v11 = vld [vmem:[#allocation7 + $0xd4] ss:$8 sps:$4 sm:$0xff]  }
  0x86   : > { %1123 = vmatprep.subr.bf16.mxu0 %v1883_v12  ;;  %v1923_v12 = vld [vmem:[#allocation7 + $0xd0] ss:$8 sps:$4 sm:$0xff]  }
  0x89   : > { %1124 = vmatpush2.bf16.msra.mxu0 %v1881_v13  ;;  %v1928_v13 = vld [vmem:[#allocation7 + $0xc4] ss:$8 sps:$4 sm:$0xff]  }
  0x8a   : > { %1125 = vmatprep.subr.bf16.mxu0 %v1886_v49 }
  0x8d   : > { %1126 = vmatpush2.bf16.msra.mxu0 %v1884_v50 }
  0x8e   : > { %1127 = vmatprep.subr.bf16.mxu0 %v1889_v51  ;;  %v1934_v51 = vld [vmem:[#allocation7 + $0xa4] ss:$8 sps:$4 sm:$0xff]  }
  0x91   : > { %1128 = vmatpush2.bf16.msra.mxu0 %v1887_v52  ;;  %v1932_v52 = vld [vmem:[#allocation7 + $0xa0] ss:$8 sps:$4 sm:$0xff]  }
  0x92   : > { %1129 = vmatprep.subr.bf16.mxu0 %v1892_v53  ;;  %v1937_v53 = vld [vmem:[#allocation7 + $0x94] ss:$8 sps:$4 sm:$0xff]  }
  0x95   : > { %1130 = vmatpush2.bf16.msra.mxu0 %v1890_v54  ;;  %v1935_v54 = vld [vmem:[#allocation7 + $0x90] ss:$8 sps:$4 sm:$0xff]  }
 0x118   : > { %v595_v19 = vpop.f32.mrf.mxu0 }
 0x119   : > { %v596_v26 = vadd.f32 %v595_v19, %v462_v21  ;;  %v1929_v19 = vld [vmem:[#allocation7 + $0xb0] ss:$8 sps:$4 sm:$0xff]  }
 0x11a   : > { %v597_v22 = vpop.f32.mrf.mxu0 }
 0x11b   : > { %v598_v24 = vadd.f32 %v597_v22, %v466_v20  ;;  %v614_v33 = vmax.f32 %v596_v26, 0.0 }
 0x11c   : > { %v599_v23 = vpop.f32.mrf.mxu0 }
 0x11d   : > { %v600_v25 = vadd.f32 %v599_v23, %v462_v21  ;;  %v615_v31 = vmax.f32 %v598_v24, 0.0 }
 0x11e   : > { %v601_v27 = vpop.f32.mrf.mxu0 }
 0x11f   : > { %v602_v28 = vadd.f32 %v601_v27, %v466_v20  ;;  %v616_v29 = vmax.f32 %v600_v25, 0.0 }
 0x120   : > { %v605_v30 = vpop.f32.mrf.mxu0 }
 0x121   : > { %v617_v32 = vmax.f32 %v602_v28, 0.0  ;;  %v622_v36 = vpack.c.bf16 %v616_v29, %v614_v33  ;;  %v606_v40 = vadd.f32 %v605_v30, %v462_v21 }
 0x122   : > { %v607_v34 = vpop.f32.mrf.mxu0 }
 0x123   : > { %v623_v35 = vpack.c.bf16 %v617_v32, %v615_v31  ;;  %v608_v38 = vadd.f32 %v607_v34, %v466_v20  ;;  %v618_v46 = vmax.f32 %v606_v40, 0.0 }
 0x124   : > { %v609_v37 = vpop.f32.mrf.mxu0 }
 0x125   : > { %v610_v39 = vadd.f32 %v609_v37, %v462_v21  ;;  %862 = vmatprep.mubr.bf16.mxu1 %v623_v35  ;;  %v619_v44 = vmax.f32 %v608_v38, 0.0 }
 0x126   : > { %v611_v41 = vpop.f32.mrf.mxu0  ;;  %863 = vmatmul.mubr.bf16.vlgmr.msra.gmra.mxu1 %v622_v36 }
 0x127   : > { %v612_v42 = vadd.f32 %v611_v41, %v466_v20  ;;  %v620_v43 = vmax.f32 %v610_v39, 0.0  ;;  %1369 = vmatpush1.bf16.msra.mxu1 %v1893_v55  ;;  %v658_v20 = vld [vmem:[%s2345_s4] sm:$0x3]  ;;  %v1940_v55 = vld [vmem:[#allocation7 + $0x84] ss:$8 sps:$4 sm:$0xff]  }
 0x128   : > { %1370 = vmatprep.subr.bf16.mxu1 %v1898_v57  ;;  %v667_v22 = vrot.slane %v658_v20, %v2302_v16  ;;  %v663_v23 = vrot.slane %v658_v20, %v2305_v17  ;;  %v927_v57 = vld [vmem:[%s2347_s6] sm:$0x3] }
 0x129   : > { %v621_v45 = vmax.f32 %v612_v42, 0.0  ;;  %v624_v48 = vpack.c.bf16 %v620_v43, %v618_v46 }
 0x12b   : > { %v625_v47 = vpack.c.bf16 %v621_v45, %v619_v44  ;;  %1371 = vmatpush1.bf16.msra.mxu1 %v1896_v58 }
 0x12c   : > { %1372 = vmatprep.subr.bf16.mxu1 %v1901_v59  ;;  %v936_v59 = vrot.slane %v927_v57, %v2302_v16 }
 0x12d   : > { %872 = vmatprep.mubr.bf16.mxu1 %v625_v47 }
 0x12e   : > { %873 = vmatmul.mubr.bf16.gmra.mxu1 %v624_v48 }
 0x12f   : > { %1373 = vmatpush1.bf16.msra.mxu1 %v1899_v60  ;;  %v932_v60 = vrot.slane %v927_v57, %v2305_v17 }
 0x130   : > { %1374 = vmatprep.subr.bf16.mxu1 %v1904_v61 }
 0x133   : > { %1375 = vmatpush1.bf16.msra.mxu1 %v1902_v62 }
 0x134   : > { %1376 = vmatprep.subr.bf16.mxu1 %v1907_v63 }
 0x137   : > { %1377 = vmatpush1.bf16.msra.mxu1 %v1905_v0 }
 0x138   : > { %1378 = vmatprep.subr.bf16.mxu1 %v1910_v1 }
 0x13b   : > { %1379 = vmatpush1.bf16.msra.mxu1 %v1908_v2 }
 0x13c   : > { %1380 = vmatprep.subr.bf16.mxu1 %v1913_v3 }
 0x13f   : > { %1381 = vmatpush1.bf16.msra.mxu1 %v1911_v4 }
 0x140   : > { %1382 = vmatprep.subr.bf16.mxu1 %v1916_v5 }
 0x143   : > { %1383 = vmatpush1.bf16.msra.mxu1 %v1914_v6 }
 0x144   : > { %1384 = vmatprep.subr.bf16.mxu1 %v1919_v7 }
 0x147   : > { %1385 = vmatpush2.bf16.msra.mxu1 %v1917_v8 }
 0x148   : > { %1386 = vmatprep.subr.bf16.mxu1 %v1922_v9 }
 0x14b   : > { %1387 = vmatpush2.bf16.msra.mxu1 %v1920_v10 }
 0x14c   : > { %1388 = vmatprep.subr.bf16.mxu1 %v1925_v11 }
 0x14f   : > { %1389 = vmatpush2.bf16.msra.mxu1 %v1923_v12 }
 0x150   : > { %1390 = vmatprep.subr.bf16.mxu1 %v1928_v13 }
 0x153   : > { %1391 = vmatpush2.bf16.msra.mxu1 %v1926_v14 }
 0x154   : > { %1392 = vmatprep.subr.bf16.mxu1 %v1931_v18 }
 0x157   : > { %1393 = vmatpush2.bf16.msra.mxu1 %v1929_v19 }
 0x158   : > { %1394 = vmatprep.subr.bf16.mxu1 %v1934_v51 }
 0x15b   : > { %1395 = vmatpush2.bf16.msra.mxu1 %v1932_v52 }
 0x15c   : > { %1396 = vmatprep.subr.bf16.mxu1 %v1937_v53 }
 0x15f   : > { %1397 = vmatpush2.bf16.msra.mxu1 %v1935_v54 }
 0x160   : > { %1398 = vmatprep.subr.bf16.mxu1 %v1940_v55 }
 0x163   : > { %1399 = vmatpush2.bf16.msra.mxu1 %v1938_v56 }
 0x1e6   : > { %v864_v21 = vpop.f32.mrf.mxu1 }
 0x1e7   : > { %v865_v28 = vadd.f32 %v864_v21, %v663_v23 }
 0x1e8   : > { %v866_v24 = vpop.f32.mrf.mxu1 }
 0x1e9   : > { %v867_v26 = vadd.f32 %v866_v24, %v667_v22  ;;  %v883_v35 = vmax.f32 %v865_v28, 0.0  ;;  %v1196_v28 = vld [vmem:[%s2349_s8] sm:$0x3] }
 0x1ea   : > { %v868_v25 = vpop.f32.mrf.mxu1 }
 0x1eb   : > { %v869_v27 = vadd.f32 %v868_v25, %v663_v23  ;;  %v884_v33 = vmax.f32 %v867_v26, 0.0 }
 0x1ec   : > { %v870_v29 = vpop.f32.mrf.mxu1 }
 0x1ed   : > { %v871_v30 = vadd.f32 %v870_v29, %v667_v22  ;;  %v885_v31 = vmax.f32 %v869_v27, 0.0  ;;  %v1429_v27 = vld [vmem:[%s2350_s9] sm:$0x3] }
 0x1ee   : > { %v874_v32 = vpop.f32.mrf.mxu1  ;;  %v1430_v29 = vunpack.c.l.bf16 %v1429_v27 }
 0x1ef   : > { %v886_v34 = vmax.f32 %v871_v30, 0.0  ;;  %v891_v38 = vpack.c.bf16 %v885_v31, %v883_v35  ;;  %v875_v42 = vadd.f32 %v874_v32, %v663_v23  ;;  %v1438_v30 = vsub.s32 2, %v2299_v15 }
 0x1f0   : > { %v876_v36 = vpop.f32.mrf.mxu1  ;;  %v1201_v31 = vrot.slane %v1196_v28, %v2305_v17  ;;  %v1205_v32 = vrot.slane %v1196_v28, %v2302_v16 }
 0x1f1   : > { %v892_v37 = vpack.c.bf16 %v886_v34, %v884_v33  ;;  %v877_v40 = vadd.f32 %v876_v36, %v667_v22  ;;  %v887_v48 = vmax.f32 %v875_v42, 0.0  ;;  %v1435_v33 = vrot.slane %v1430_v29, %v2305_v17 }
 0x1f2   : > { %v878_v39 = vpop.f32.mrf.mxu1  ;;  %v1439_v34 = vrot.slane %v1430_v29, %v1438_v30 }
 0x1f3   : > { %v879_v41 = vadd.f32 %v878_v39, %v663_v23  ;;  %1131 = vmatprep.mubr.bf16.mxu0 %v892_v37  ;;  %v888_v46 = vmax.f32 %v877_v40, 0.0  ;;  %v1445_v40 = vrot.slane %v1435_v33, %v2305_v17 }
 0x1f4   : > { %v880_v43 = vpop.f32.mrf.mxu1  ;;  %1132 = vmatmul.mubr.bf16.vlgmr.msra.gmra.mxu0 %v891_v38 }
 0x1f5   : > { %v881_v44 = vadd.f32 %v880_v43, %v667_v22  ;;  %v889_v45 = vmax.f32 %v879_v41, 0.0  ;;  %v1449_v41 = vrot.slane %v1439_v34, %v2305_v17 }
 0x1f7   : > { %v890_v47 = vmax.f32 %v881_v44, 0.0  ;;  %v893_v50 = vpack.c.bf16 %v889_v45, %v887_v48 }
 0x1f9   : > { %v894_v49 = vpack.c.bf16 %v890_v47, %v888_v46 }
 0x1fb   : > { %1141 = vmatprep.mubr.bf16.mxu0 %v894_v49 }
 0x1fc   : > { %1142 = vmatmul.mubr.bf16.gmra.mxu0 %v893_v50 }
 0x2b4   : > { %v1133_v58 = vpop.f32.mrf.mxu0 }
 0x2b5   : > { %v1134_v1 = vadd.f32 %v1133_v58, %v932_v60 }
 0x2b6   : > { %v1135_v61 = vpop.f32.mrf.mxu0 }
 0x2b7   : > { %v1136_v63 = vadd.f32 %v1135_v61, %v936_v59  ;;  %v1152_v8 = vmax.f32 %v1134_v1, 0.0 }
 0x2b8   : > { %v1137_v62 = vpop.f32.mrf.mxu0 }
 0x2b9   : > { %v1138_v0 = vadd.f32 %v1137_v62, %v932_v60  ;;  %v1153_v6 = vmax.f32 %v1136_v63, 0.0 }
 0x2ba   : > { %v1139_v2 = vpop.f32.mrf.mxu0 }
 0x2bb   : > { %v1140_v3 = vadd.f32 %v1139_v2, %v936_v59  ;;  %v1154_v4 = vmax.f32 %v1138_v0, 0.0 }
 0x2bc   : > { %v1143_v5 = vpop.f32.mrf.mxu0 }
 0x2bd   : > { %v1155_v7 = vmax.f32 %v1140_v3, 0.0  ;;  %v1160_v11 = vpack.c.bf16 %v1154_v4, %v1152_v8  ;;  %v1144_v18 = vadd.f32 %v1143_v5, %v932_v60 }
 0x2be   : > { %v1145_v9 = vpop.f32.mrf.mxu0 }
 0x2bf   : > { %v1161_v10 = vpack.c.bf16 %v1155_v7, %v1153_v6  ;;  %v1146_v13 = vadd.f32 %v1145_v9, %v936_v59  ;;  %v1156_v24 = vmax.f32 %v1144_v18, 0.0  ;;  %v1726_v6 = vld [vmem:[#allocation2] ss:$0 sm:$0xff] }
 0x2c0   : > { %v1147_v12 = vpop.f32.mrf.mxu0 }
 0x2c1   : > { %v1148_v14 = vadd.f32 %v1147_v12, %v932_v60  ;;  %1400 = vmatprep.mubr.bf16.mxu1 %v1161_v10  ;;  %v1157_v22 = vmax.f32 %v1146_v13, 0.0 }
 0x2c2   : > { %v1149_v19 = vpop.f32.mrf.mxu0  ;;  %1401 = vmatmul.mubr.bf16.vlgmr.msra.gmra.mxu1 %v1160_v11 }
 0x2c3   : > { %v1150_v20 = vadd.f32 %v1149_v19, %v936_v59  ;;  %v1158_v21 = vmax.f32 %v1148_v14, 0.0 }
 0x2c5   : > { %v1159_v23 = vmax.f32 %v1150_v20, 0.0  ;;  %v1162_v26 = vpack.c.bf16 %v1158_v21, %v1156_v24 }
 0x2c7   : > { %v1163_v25 = vpack.c.bf16 %v1159_v23, %v1157_v22 }
 0x2c9   : > { %1410 = vmatprep.mubr.bf16.mxu1 %v1163_v25 }
 0x2ca   : > { %1411 = vmatmul.mubr.bf16.gmra.mxu1 %v1162_v26 }
 0x382   : > { %v1402_v35 = vpop.f32.mrf.mxu1 }
 0x383   : > { %v1403_v36 = vadd.f32 %v1402_v35, %v1201_v31 }
 0x384   : > { %v1404_v37 = vpop.f32.mrf.mxu1 }
 0x385   : > { %v1421_v38 = vmax.f32 %v1403_v36, 0.0  ;;  %v1405_v39 = vadd.f32 %v1404_v37, %v1205_v32 }
 0x386   : > { %v1406_v42 = vpop.f32.mrf.mxu1 }
 0x387   : > { %v1422_v43 = vmax.f32 %v1405_v39, 0.0  ;;  %v1407_v44 = vadd.f32 %v1406_v42, %v1201_v31  ;;  %v1450_v47 = vmul.f32 %v1445_v40, %v1421_v38 }
 0x388   : > { %v1408_v15 = vpop.f32.mrf.mxu1 }
 0x389   : > { %v1423_v45 = vmax.f32 %v1407_v44, 0.0  ;;  %v1409_v46 = vadd.f32 %v1408_v15, %v1205_v32  ;;  %v1451_v16 = vmul.f32 %v1449_v41, %v1422_v43 }
 0x38a   : > { %v1412_v48 = vpop.f32.mrf.mxu1 }
 0x38b   : > { %v1424_v49 = vmax.f32 %v1409_v46, 0.0  ;;  %v1413_v50 = vadd.f32 %v1412_v48, %v1201_v31  ;;  %v1458_v51 = vadd.f32 %v1451_v16, %v1450_v47  ;;  %v1452_v53 = vmul.f32 %v1445_v40, %v1423_v45 }
 0x38c   : > { %v1414_v52 = vpop.f32.mrf.mxu1 }
 0x38d   : > { %v1453_v54 = vmul.f32 %v1449_v41, %v1424_v49  ;;  %v1425_v55 = vmax.f32 %v1413_v50, 0.0  ;;  %v1415_v56 = vadd.f32 %v1414_v52, %v1205_v32  ;;  %1459 = vadd.xlane.f32.xlu0 %v1458_v51 }
 0x38e   : > { %v1416_v57 = vpop.f32.mrf.mxu1 }
 0x38f   : > { %v1426_v17 = vmax.f32 %v1415_v56, 0.0  ;;  %v1417_v58 = vadd.f32 %v1416_v57, %v1201_v31  ;;  %v1461_v59 = vadd.f32 %v1453_v54, %v1452_v53  ;;  %v1454_v63 = vmul.f32 %v1445_v40, %v1425_v55 }
 0x390   : > { %v1418_v60 = vpop.f32.mrf.mxu1 }
 0x391   : > { %v1427_v61 = vmax.f32 %v1417_v58, 0.0  ;;  %v1419_v62 = vadd.f32 %v1418_v60, %v1205_v32  ;;  %1462 = vadd.xlane.f32.xlu0 %v1461_v59  ;;  %v1455_v0 = vmul.f32 %v1449_v41, %v1426_v17 }
 0x393   : > { %v1428_v1 = vmax.f32 %v1419_v62, 0.0  ;;  %v1464_v2 = vadd.f32 %v1455_v0, %v1454_v63  ;;  %v1456_v3 = vmul.f32 %v1445_v40, %v1427_v61 }
 0x395   : > { %v1457_v4 = vmul.f32 %v1449_v41, %v1428_v1  ;;  %1465 = vadd.xlane.f32.xlu1 %v1464_v2 }
 0x397   : > { %v1467_v5 = vadd.f32 %v1457_v4, %v1456_v3 }
 0x399   : > { %1468 = vadd.xlane.f32.xlu1 %v1467_v5 }
 0x416   : > { %v1460_v7 = vpop.xlane.xlu0 %1459 }
 0x417   : > { %v1477_v8 = vadd.f32 %v1726_v6, %v1460_v7 }
 0x419   : > { %v1481_v9 = vsub.f32 0.0, %v1477_v8 }
 0x41a   : > { %v1463_v10 = vpop.xlane.xlu0 %1462 }
 0x41b   : > { %v1485_v11 = vmul.f32 1.442695, %v1481_v9  ;;  %v1478_v12 = vadd.f32 %v1726_v6, %v1463_v10 }
 0x41d   : > { %1941 = vpow2.f32 %v1485_v11  ;;  %v1482_v13 = vsub.f32 0.0, %v1478_v12 }
 0x41e   : > { %v1466_v14 = vpop.xlane.xlu1 %1465 }
 0x41f   : > { %v1487_v18 = vmul.f32 1.442695, %v1482_v13  ;;  %v1479_v19 = vadd.f32 %v1726_v6, %v1466_v14 }
 0x421   : > { %1943 = vpow2.f32 %v1487_v18  ;;  %v1483_v20 = vsub.f32 0.0, %v1479_v19 }
 0x422   : > { %v1469_v21 = vpop.xlane.xlu1 %1468 }
 0x423   : > { %v1489_v22 = vmul.f32 1.442695, %v1483_v20  ;;  %v1480_v23 = vadd.f32 %v1726_v6, %v1469_v21 }
 0x425   : > { %1945 = vpow2.f32 %v1489_v22  ;;  %v1484_v24 = vsub.f32 0.0, %v1480_v23 }
 0x427   : > { %v1491_v25 = vmul.f32 1.442695, %v1484_v24 }
 0x429   : > { %1947 = vpow2.f32 %v1491_v25 }
 0x42a   : > { %v1942_v26 = vpop.eup %1941 }
 0x42b   : > { %v1493_v27 = vadd.f32 1.0, %v1942_v26 }
 0x42d   : > { %1949 = vrcp.f32 %v1493_v27 }
 0x42e   : > { %v1944_v28 = vpop.eup %1943 }
 0x42f   : > { %v1494_v29 = vadd.f32 1.0, %v1944_v28 }
 0x431   : > { %1951 = vrcp.f32 %v1494_v29 }
 0x432   : > { %v1946_v30 = vpop.eup %1945 }
 0x433   : > { %v1495_v31 = vadd.f32 1.0, %v1946_v30 }
 0x435   : > { %1953 = vrcp.f32 %v1495_v31 }
 0x436   : > { %v1948_v32 = vpop.eup %1947 }
 0x437   : > { %v1496_v33 = vadd.f32 1.0, %v1948_v32 }
 0x439   : > { %1955 = vrcp.f32 %v1496_v33 }
 0x43a   : > { %v1950_v34 = vpop.eup %1949 }
 0x43b   : > { %1506 = vst.msk [vmem:[%s434_s13] sm:$0xff] %vm1505_vm0, %v1950_v34 }
 0x43e   : > { %v1952_v35 = vpop.eup %1951 }
 0x43f   : > { %1507 = vst.msk [vmem:[%s434_s13 + $0x8] sm:$0xff] %vm1505_vm0, %v1952_v35 }
 0x442   : > { %v1954_v36 = vpop.eup %1953 }
 0x443   : > { %1508 = vst.msk [vmem:[%s434_s13 + $0x10] sm:$0xff] %vm1505_vm0, %v1954_v36 }
 0x446   : > { %v1956_v37 = vpop.eup %1955 }
 0x447   : > { %1509 = vst.msk [vmem:[%s434_s13 + $0x18] sm:$0xff] %vm1505_vm0, %v1956_v37 }
 0x448 PF: > { %s25_s19 = sadd.s32 1, %s2049_s19  }
 0x449   : > { %p22_p2 = scmp.ge.s32.totalorder %s25_s19, 6  }
 0x44b   :  { %24 = sbr.rel (!%p22_p2) target bundleno = 5 (0x5), region = 107 }
 0x450   :  { %1532 = vsyncpa [#allocation4], 1 }
 0x451   :  { %1534 = vsyncpa [#allocation4 + $0x1], 1 }
 0x452   :  { %1535 = vsyncpa [#allocation6], 1 }

</bundles_post_ra>
